<compile_context>
chip_gen: v7x
topology: tpu7x:2x2x1
jax: 0.10.0
libtpu: 0.0.40
codegen_flags: <defaults>
</compile_context>

<pallas_src>
import math

import jax
import jax.numpy as jnp
from jax.experimental import pallas as pl
from jax.experimental.pallas import tpu as pltpu


def _broadcast_rows_kernel(pattern_ref, out_ref):
    # pattern_ref: (1, TL) VMEM tile holding (copies of) the constant row.
    # out_ref:     (TR, TL) VMEM tile of the output; replicate the row TR times.
    out_ref[...] = jnp.broadcast_to(pattern_ref[...], out_ref.shape)


def _round_down(v: int, m: int) -> int:
    return max(m, (v // m) * m)


def constant_input_forward(const_param: jax.Array, x: jax.Array,
                           *, force_pallas: bool = False) -> jax.Array:
    """Broadcast the learned constant (1, C, S) to (batch, C, S).

    `x` is only consulted for its leading (batch) dimension, matching the
    PyTorch module's forward semantics.
    """
    batch = x.shape[0]
    _, channel, size = const_param.shape
    cs = channel * size
    total = batch * cs
    dtype = const_param.dtype
    itemsize = jnp.dtype(dtype).itemsize

    # ---- small-output bypass ----------------------------------------------
    # For tiny outputs (the module default is C=4, S=4 -> 64 B per batch elem)
    # a pallas_call launch plus per-step overhead dwarfs the HBM write, and a
    # plain broadcast can fuse into the consumer.
    if not force_pallas and total * itemsize <= (1 << 20):
        return jnp.broadcast_to(const_param, (batch, channel, size))

    # ---- lane-dense flat layout ---------------------------------------------
    # Present the flattened output as (rows, lane).  Prefer a lane width that
    # is a multiple of 128 so every store is a full, unmasked vreg store.
    flat = const_param.reshape(1, cs)
    if cs % 128 == 0:
        lane, pattern, rows = cs, flat, batch
    else:
        lcm = cs * 128 // math.gcd(cs, 128)
        if total % lcm == 0 and lcm * itemsize <= (512 << 10):
            lane = lcm
            pattern = jnp.tile(flat, (1, lane // cs))
            rows = total // lane
        else:
            # Fallback: last dim = cs (may be masked stores, still correct).
            lane, pattern, rows = cs, flat, batch

    # ---- block sizing --------------------------------------------------------
    # dtype-aware sublane granularity: f32 -> 8, bf16/f16 -> 16, int8/fp8 -> 32.
    sub = {1: 32, 2: 16}.get(itemsize, 8)

    max_block_bytes = 8 << 20                 # per output block (double-buffered)
    max_block_elems = max(1, max_block_bytes // itemsize)

    # Column blocking only if even `sub` rows of `lane` would exceed the budget.
    if lane * sub <= max_block_elems:
        tl = lane
    else:
        tl = max(128, ((max_block_elems // sub) // 128) * 128)
    gc = pl.cdiv(lane, tl)

    row_budget = _round_down(max_block_elems // tl, sub)   # >= sub by construction
    tr = min(rows, row_budget)
    if tr < rows:
        tr = _round_down(tr, sub)
        # Prefer a row tile that divides `rows` exactly (avoids a masked tail
        # block), as long as it doesn't shrink the block by more than 2x.
        if rows % tr != 0:
            best = 0
            d = 1
            while d * d <= rows:
                if rows % d == 0:
                    for cand in (d, rows // d):
                        if cand <= tr and cand % sub == 0 and cand > best:
                            best = cand
                d += 1
            if best >= max(sub, tr // 2):
                tr = best
    elif rows >= 2 * sub:
        # Enough work for >=2 blocks: split evenly so dual-TC chips (v7x) keep
        # both TensorCores busy.  Harmless extra step on single-TC chips.
        tr = _round_down(pl.cdiv(rows, 2), sub)
    gr = pl.cdiv(rows, tr)

    cost = pl.CostEstimate(
        flops=0,
        transcendentals=0,
        bytes_accessed=total * itemsize + lane * itemsize,
    )

    out_flat = pl.pallas_call(
        _broadcast_rows_kernel,
        out_shape=jax.ShapeDtypeStruct((rows, lane), dtype),
        grid_spec=pltpu.PrefetchScalarGridSpec(
            num_scalar_prefetch=0,
            grid=(gr, gc),
            in_specs=[
                # Invariant in the row axis -> the tiny pattern block is DMA'd
                # once per column block and reused across all row steps.
                pl.BlockSpec((1, tl), lambda r, c: (0, c)),
            ],
            out_specs=pl.BlockSpec((tr, tl), lambda r, c: (r, c)),
        ),
        compiler_params=pltpu.CompilerParams(
            dimension_semantics=("parallel", "parallel"),
            vmem_limit_bytes=48 << 20,
        ),
        cost_estimate=cost,
    )(pattern)

    return out_flat.reshape(batch, channel, size)


if __name__ == "__main__":
    key = jax.random.PRNGKey(0)
    k_param, k_x = jax.random.split(key)

    # ---- module-default shapes: ConstantInput(channel=4, size=4), batch=2 ----
    channel, size, batch = 4, 4, 2
    const_param = jax.random.normal(k_param, (1, channel, size), dtype=jnp.float32)
    x = jax.random.normal(k_x, (batch, channel, size), dtype=jnp.float32)

    # Default path (small-output bypass).
    out = jax.block_until_ready(constant_input_forward(const_param, x))
    ref = jnp.broadcast_to(const_param, (batch, channel, size))
    assert out.shape == (batch, channel, size)
    assert jnp.allclose(out, ref), "bypass path mismatch"

    # Forced Pallas path on the same small shape (lcm lane-dense: lane=128, rows=1).
    out_k = jax.block_until_ready(
        constant_input_forward(const_param, x, force_pallas=True))
    assert out_k.shape == (batch, channel, size)
    assert jnp.allclose(out_k, ref), "pallas lcm lane-dense path mismatch"

    # Forced Pallas path, cs multiple of 128 and >=2 row blocks (dual-TC split).
    c2, s2, b2 = 8, 32, 16
    cp2 = jax.random.normal(k_param, (1, c2, s2), dtype=jnp.float32)
    x2 = jnp.zeros((b2, 1), dtype=jnp.float32)           # only shape[0] is used
    out2 = jax.block_until_ready(
        constant_input_forward(cp2, x2, force_pallas=True))
    ref2 = jnp.broadcast_to(cp2, (b2, c2, s2))
    assert out2.shape == (b2, c2, s2)
    assert jnp.allclose(out2, ref2), "pallas multi-block path mismatch"

    # Forced Pallas fallback path (lane = C*S, not a multiple of 128).
    c3, s3, b3 = 4, 5, 3
    cp3 = jax.random.normal(k_param, (1, c3, s3), dtype=jnp.float32)
    x3 = jnp.zeros((b3, 7), dtype=jnp.float32)
    out3 = jax.block_until_ready(
        constant_input_forward(cp3, x3, force_pallas=True))
    ref3 = jnp.broadcast_to(cp3, (b3, c3, s3))
    assert out3.shape == (b3, c3, s3)
    assert jnp.allclose(out3, ref3), "pallas fallback path mismatch"

    print("KERNEL_OK")
</pallas_src>

<mosaic_0001>
module attributes {stable_mosaic.version = 11 : i64} {
  func.func @_broadcast_rows_kernel(%arg0: i32, %arg1: i32, %arg2: memref<1x16xf32, #tpu.memory_space<vmem>>, %arg3: memref<2x16xf32, #tpu.memory_space<vmem>>) attributes {dimension_semantics = [#tpu.dimension_semantics<parallel>, #tpu.dimension_semantics<parallel>], iteration_bounds = array<i64: 1, 1>, scalar_prefetch = 0 : i64, scratch_operands = 0 : i64, tpu.core_type = #tpu.core_type<tc>, window_params = [{transform_indices = @transform_0, window_bounds = array<i64: 1, 16>}, {transform_indices = @transform_1, window_bounds = array<i64: 2, 16>}]} {
    %c0 = arith.constant 0 : index
    %c0_0 = arith.constant 0 : index
    %0 = vector.load %arg2[%c0, %c0_0] : memref<1x16xf32, #tpu.memory_space<vmem>>, vector<1x16xf32>
    %1 = vector.shape_cast %0 : vector<1x16xf32> to vector<1x16xf32>
    %2 = vector.broadcast %1 : vector<1x16xf32> to vector<2x16xf32>
    %c0_1 = arith.constant 0 : index
    %c0_2 = arith.constant 0 : index
    %3 = vector.load %arg3[%c0_1, %c0_2] : memref<2x16xf32, #tpu.memory_space<vmem>>, vector<2x16xf32>
    tpu.vector_store %arg3[%c0_1, %c0_2], %2 {strides = array<i32>} : memref<2x16xf32, #tpu.memory_space<vmem>>, vector<2x16xf32>,
    return
  }
  func.func @transform_0(%arg0: i32, %arg1: i32) -> (i32, i32) {
    %c0_i32 = arith.constant 0 : i32
    %c0_i32_0 = arith.constant 0 : i32
    return %c0_i32, %arg1 : i32, i32
  }
  func.func @transform_1(%arg0: i32, %arg1: i32) -> (i32, i32) {
    %c0_i32 = arith.constant 0 : i32
    return %arg0, %arg1 : i32, i32
  }
}

</mosaic_0001>

<bundles_post_ra>
// kernel: tpu_custom_call.1
= control target key start
LH: loop header
LB: loop body
LE: loop exit
PB: predicated region body
PF: predicated region fallthrough
CT: control target
= control target key end

     0   :  { %6 = vsyncpa [#allocation3], 0  ;;  %s132_s0 = inlined_call_operand.hbm [shape: f32[1,16], index: 0, kind: input, shape index: {}]   ;;  %s133_s1 = inlined_call_operand.hbm [shape: f32[2,16], index: 1, kind: output, shape index: {}]  }
   0x1   :  { %7 = vsyncpa [#allocation4], 0  ;;  %s96_s6 = smov [#allocation2]   ;;  %s48_s10 = scalar_lea.hbm %s132_s0, 16 }
   0x2   :  { %s14_s7 = sshll.u32 %s96_s6, 4  ;;  %p49_p0 = scmp.ne.s32.totalorder %s132_s0, %s48_s10  ;;  %s15_s7 = int_to_ptr.vmem [resolvable:$true] %s14_s7 }
   0x3   :  { %p52_p1 = scmp.lt.u32.totalorder %s48_s10, %s132_s0 }
   0x5   :  { %p54_p2 = pnand %p52_p1, %p49_p0 }
   0x7   :  { %57 = shalt.err (!%p54_p2)
}
   0x8   :  { %s58_s15 = scalar_lea.vmem %s15_s7, 16  ;;  %s62_s16 = scalar_lea.vmem %s15_s7, 32 }
   0x9   :  { %p59_p3 = scmp.ne.s32.totalorder %s15_s7, %s58_s15  ;;  %p63_p4 = scmp.lt.s32.totalorder %s15_s7, %s15_s7 }
   0xa   :  { %p64_p5 = scmp.lt.s32.totalorder %s62_s16, %s58_s15 }
   0xc   :  { %p65_p6 = por %p64_p5, %p63_p4 }
   0xe   :  { %p66_p7 = pnand %p65_p6, %p59_p3 }
  0x10   :  { %69 = shalt.err (!%p66_p7)
}
  0x11   :  { %17 = dma.hbm_to_vmem [thread:$0]  %s132_s0, 16, %s15_s7, [#allocation3]  }
  0x12   :  { %92 = dma.done.wait [#allocation3], 16  }
  0x13   :  { %93 = vsyncadd [#allocation3], 4294967280  ;;  %s97_s19 = smov [#allocation5]   ;;  %vm28_vm0 = vcmask 123904   ;;  %v45_v0 = vld [vmem:[#allocation2] ss:$0 sm:$0xff] }
  0x14   :  { %s36_s20 = sshll.u32 %s97_s19, 4  ;;  %29 = vst.msk [vmem:[#allocation5] sm:$0x3] %vm28_vm0, %v45_v0  ;;  %s37_s20 = int_to_ptr.vmem [resolvable:$true] %s36_s20 }
  0x15   :  { %s70_s21 = scalar_lea.vmem %s37_s20, 32  ;;  %p75_p9 = scmp.lt.s32.totalorder %s37_s20, %s37_s20 }
  0x16   :  { %p71_p8 = scmp.ne.s32.totalorder %s37_s20, %s70_s21  ;;  %p76_p10 = scmp.lt.s32.totalorder %s70_s21, %s70_s21 }
  0x18   :  { %p77_p11 = por %p76_p10, %p75_p9 }
  0x1a   :  { %p78_p12 = pnand %p77_p11, %p71_p8 }
  0x1c   :  { %81 = shalt.err (!%p78_p12)
}
  0x1d   :  { %s82_s24 = scalar_lea.hbm %s133_s1, 32 }
  0x1e   :  { %p83_p13 = scmp.ne.s32.totalorder %s133_s1, %s82_s24  ;;  %p86_p0 = scmp.lt.u32.totalorder %s82_s24, %s133_s1 }
  0x20   :  { %p88_p1 = pnand %p86_p0, %p83_p13 }
  0x22   :  { %91 = shalt.err (!%p88_p1)
}
  0x23   :  { %39 = dma.vmem_to_hbm [thread:$0]  %s37_s20, 32, %s133_s1, [#allocation4]  }
  0x24   :  { %94 = dma.done.wait [#allocation4], 32  }
  0x25   :  { %95 = vsyncadd [#allocation4], 4294967264 }
  0x26   :  { %43 = vsyncpa [#allocation3], 1 }
  0x27   :  { %44 = vsyncpa [#allocation4], 1 }

</bundles_post_ra>
